<compile_context>
chip_gen: v5e
topology: v5e:2x2
jax: 0.10.0
libtpu: 0.0.40
codegen_flags: <defaults>
</compile_context>

<pallas_src>
import math

import numpy as np
import jax
import jax.numpy as jnp
from jax.experimental import pallas as pl
from jax.experimental.pallas import tpu as pltpu

# ----------------------------- model dims (small, consistent with BERT cfg) ---
BATCH = 2
SEQ = 8
HIDDEN = 32
NUM_HEADS = 4
HEAD_DIM = HIDDEN // NUM_HEADS
INTERMEDIATE = 128
LN_EPS = 1e-12


# ----------------------------------- helpers ---------------------------------
def _layer_norm(x, gamma, beta, eps):
    mean = jnp.mean(x, axis=-1, keepdims=True)
    var = jnp.mean(jnp.square(x - mean), axis=-1, keepdims=True)  # biased, like F.layer_norm
    return (x - mean) * jax.lax.rsqrt(var + eps) * gamma + beta


def _gelu_exact(x):
    # nn.GELU() default = exact erf-based GELU.
    return 0.5 * x * (1.0 + jax.lax.erf(x * (1.0 / math.sqrt(2.0))))


# ----------------------------------- kernel ----------------------------------
def _make_kernel(B, S, H, num_heads, head_dim, eps):
    BS = B * S
    scale = 1.0 / math.sqrt(head_dim)

    def kernel(x_ref,
               wqkv_ref, bqkv_ref,
               wao_ref, bao_ref, g1_ref, be1_ref,
               wi_ref, bi_ref, wo_ref, bo_ref, g2_ref, be2_ref,
               layer_ref, probs_ref, attn_ref):
        # x is already (B*S, H); every dense layer sees all 16 rows at once.
        x = x_ref[...]

        # ---------------- CoFiSelfAttention ----------------
        # Fused Q/K/V projection: one (BS, H) x (H, 3H) matmul.
        qkv = jnp.dot(x, wqkv_ref[...], preferred_element_type=jnp.float32) + bqkv_ref[...]

        # Re-group to per-(batch, head): one batched (S, 3H)->(3H, S) transpose,
        # sublane slices at multiples of 8, otherwise free leading-dim reshapes.
        r = qkv.reshape(B, S, 3 * H)                  # free: sublane split at S=8
        rt = jnp.swapaxes(r, 1, 2)                    # (B, 3H, S)
        q_b = rt[:, 0:H, :] * scale                   # fold 1/sqrt(d) into q once
        k_b = rt[:, H:2 * H, :]
        v_b = rt[:, 2 * H:3 * H, :]

        q3 = jnp.swapaxes(q_b.reshape(B * num_heads, head_dim, S), 1, 2)  # (B*nh, S, d)
        k3 = k_b.reshape(B * num_heads, head_dim, S)                      # (B*nh, d, S)
        v3 = v_b.reshape(B * num_heads, head_dim, S)                      # (B*nh, d, S)

        # Per-(batch, head) attention: no cross-batch columns, no mask needed.
        # TODO(synk): additive attention_mask path not wired (forward call uses None).
        scores = jnp.einsum("xsd,xdt->xst", q3, k3,
                            preferred_element_type=jnp.float32)           # (B*nh, S, S)
        scores = scores - jnp.max(scores, axis=-1, keepdims=True)
        e = jnp.exp(scores)
        # Exact reciprocal so the returned attention_probs rows sum to 1.
        probs = e / jnp.sum(e, axis=-1, keepdims=True)                    # (B*nh, S, S)

        # Lane-dense single store; wrapper reshapes to (B, nh, S, S) in HBM.
        probs_ref[...] = probs.reshape(B * num_heads, S * S)

        # Context kept transposed (B*nh, d, S): head merge back to (BS, H) uses
        # free leading-dim reshapes + one batched (H, S)->(S, H) transpose.
        ctx3 = jnp.einsum("xdt,xst->xds", v3, probs,
                          preferred_element_type=jnp.float32)             # (B*nh, d, S)
        ctx = jnp.swapaxes(ctx3.reshape(B, H, S), 1, 2).reshape(BS, H)    # (BS, H)

        # ---------------- CoFiBertSelfOutput ----------------
        # TODO(synk): training-time `hidden_states.sum()==0` short-circuit and head/hidden
        # z-mask multiplies not reproduced; eval-mode residual + LayerNorm path is used.
        ao = jnp.dot(ctx, wao_ref[...], preferred_element_type=jnp.float32) + bao_ref[...]
        attn_out = _layer_norm(ao + x, g1_ref[...], be1_ref[...], eps)
        attn_ref[...] = attn_out

        # ---------------- CoFiIntermediate + CoFiOutput ----------------
        inter = _gelu_exact(
            jnp.dot(attn_out, wi_ref[...], preferred_element_type=jnp.float32) + bi_ref[...])
        out = jnp.dot(inter, wo_ref[...], preferred_element_type=jnp.float32) + bo_ref[...]
        layer_ref[...] = _layer_norm(out + attn_out, g2_ref[...], be2_ref[...], eps)

    return kernel


# ---------------------------------- wrapper -----------------------------------
def cofi_bert_layer(hidden_states, params, *, num_heads=NUM_HEADS, eps=LN_EPS):
    B, S, H = hidden_states.shape
    head_dim = H // num_heads
    BS = B * S

    # wqkv/bqkv are pre-fused at param-init time (no per-call concat).
    args = (hidden_states.reshape(BS, H),                 # free HBM reshape
            params["wqkv"], params["bqkv"],
            params["wao"], params["bao"], params["g1"], params["be1"],
            params["wi"], params["bi"], params["wo"], params["bo"],
            params["g2"], params["be2"])

    # All kernel outputs are 2-D / lane-dense; reshape back to module shapes in HBM.
    out_shape = (
        jax.ShapeDtypeStruct((BS, H), jnp.float32),               # layer_output (flat)
        jax.ShapeDtypeStruct((B * num_heads, S * S), jnp.float32),  # attention_probs (flat)
        jax.ShapeDtypeStruct((BS, H), jnp.float32),               # attention_output (flat)
    )

    # Single kernel invocation, no grid: everything resident in VMEM.
    # TODO(synk): for real BERT dims (H=768, I=3072, long S) reintroduce a batch/seq grid
    # marked "parallel" (uses v7x's 2 TCs), tile the FFN weights against v7x's 64 MiB VMEM
    # (32 MiB default scoped, x2 double-buffering), cast MXU operands to bf16 on v6e/v7x
    # (keep LayerNorm/GELU/softmax math f32, esp. on v5e), and set vmem_limit_bytes.
    def vmem_spec():
        return pl.BlockSpec(memory_space=pltpu.MemorySpace.VMEM)

    layer2d, probs2d, attn2d = pl.pallas_call(
        _make_kernel(B, S, H, num_heads, head_dim, eps),
        out_shape=out_shape,
        in_specs=[vmem_spec() for _ in args],
        out_specs=tuple(vmem_spec() for _ in out_shape),
    )(*args)

    return (layer2d.reshape(B, S, H),
            probs2d.reshape(B, num_heads, S, S),
            attn2d.reshape(B, S, H))


# ------------------------------ pure-JAX reference ----------------------------
def reference(hidden_states, params, *, num_heads=NUM_HEADS, eps=LN_EPS):
    B, S, H = hidden_states.shape
    d = H // num_heads
    x = hidden_states
    q = x @ params["wq"] + params["bq"]
    k = x @ params["wk"] + params["bk"]
    v = x @ params["wv"] + params["bv"]
    qh = q.reshape(B, S, num_heads, d).transpose(0, 2, 1, 3)
    kh = k.reshape(B, S, num_heads, d).transpose(0, 2, 1, 3)
    vh = v.reshape(B, S, num_heads, d).transpose(0, 2, 1, 3)
    scores = (qh @ kh.transpose(0, 1, 3, 2)) / math.sqrt(d)
    probs = jax.nn.softmax(scores, axis=-1)
    ctx = (probs @ vh).transpose(0, 2, 1, 3).reshape(B, S, H)
    ao = ctx @ params["wao"] + params["bao"]
    attn_out = _layer_norm(ao + x, params["g1"], params["be1"], eps)
    inter = _gelu_exact(attn_out @ params["wi"] + params["bi"])
    out = inter @ params["wo"] + params["bo"]
    layer = _layer_norm(out + attn_out, params["g2"], params["be2"], eps)
    return layer, probs, attn_out


# --------------------------------- param init ---------------------------------
def init_params(key):
    ks = jax.random.split(key, 12)
    n = lambda k, shape, s=0.05: (jax.random.normal(k, shape, jnp.float32) * s)
    p = {
        "wq": n(ks[0], (HIDDEN, HIDDEN)),  "bq": n(ks[1], (1, HIDDEN), 0.02),
        "wk": n(ks[2], (HIDDEN, HIDDEN)),  "bk": n(ks[3], (1, HIDDEN), 0.02),
        "wv": n(ks[4], (HIDDEN, HIDDEN)),  "bv": n(ks[5], (1, HIDDEN), 0.02),
        "wao": n(ks[6], (HIDDEN, HIDDEN)), "bao": n(ks[7], (1, HIDDEN), 0.02),
        "g1": jnp.ones((1, HIDDEN), jnp.float32),  "be1": jnp.zeros((1, HIDDEN), jnp.float32),
        "wi": n(ks[8], (HIDDEN, INTERMEDIATE)),    "bi": n(ks[9], (1, INTERMEDIATE), 0.02),
        "wo": n(ks[10], (INTERMEDIATE, HIDDEN)),   "bo": n(ks[11], (1, HIDDEN), 0.02),
        "g2": jnp.ones((1, HIDDEN), jnp.float32),  "be2": jnp.zeros((1, HIDDEN), jnp.float32),
    }
    # Fuse Q/K/V projection weights once, outside the per-call path.
    p["wqkv"] = jnp.concatenate([p["wq"], p["wk"], p["wv"]], axis=1)   # (H, 3H)
    p["bqkv"] = jnp.concatenate([p["bq"], p["bk"], p["bv"]], axis=1)   # (1, 3H)
    return p


if __name__ == "__main__":
    key = jax.random.PRNGKey(0)
    k_x, k_p = jax.random.split(key)
    hidden_states = jax.random.normal(k_x, (BATCH, SEQ, HIDDEN), jnp.float32)
    params = init_params(k_p)

    layer_out, attn_probs, attn_out = cofi_bert_layer(hidden_states, params)
    jax.block_until_ready((layer_out, attn_probs, attn_out))

    ref_layer, ref_probs, ref_attn = reference(hidden_states, params)
    np.testing.assert_allclose(np.asarray(layer_out), np.asarray(ref_layer), rtol=2e-2, atol=2e-2)
    np.testing.assert_allclose(np.asarray(attn_probs), np.asarray(ref_probs), rtol=2e-2, atol=2e-2)
    np.testing.assert_allclose(np.asarray(attn_out), np.asarray(ref_attn), rtol=2e-2, atol=2e-2)

    print("KERNEL_OK")
</pallas_src>

<mosaic_0001>
module attributes {stable_mosaic.version = 11 : i64} {
  func.func @kernel(%arg0: memref<16x32xf32, #tpu.memory_space<vmem>>, %arg1: memref<32x96xf32, #tpu.memory_space<vmem>>, %arg2: memref<1x96xf32, #tpu.memory_space<vmem>>, %arg3: memref<32x32xf32, #tpu.memory_space<vmem>>, %arg4: memref<1x32xf32, #tpu.memory_space<vmem>>, %arg5: memref<1x32xf32, #tpu.memory_space<vmem>>, %arg6: memref<1x32xf32, #tpu.memory_space<vmem>>, %arg7: memref<32x128xf32, #tpu.memory_space<vmem>>, %arg8: memref<1x128xf32, #tpu.memory_space<vmem>>, %arg9: memref<128x32xf32, #tpu.memory_space<vmem>>, %arg10: memref<1x32xf32, #tpu.memory_space<vmem>>, %arg11: memref<1x32xf32, #tpu.memory_space<vmem>>, %arg12: memref<1x32xf32, #tpu.memory_space<vmem>>, %arg13: memref<16x32xf32, #tpu.memory_space<vmem>>, %arg14: memref<8x64xf32, #tpu.memory_space<vmem>>, %arg15: memref<16x32xf32, #tpu.memory_space<vmem>>) attributes {dimension_semantics = [], scalar_prefetch = 0 : i64, scratch_operands = 0 : i64, tpu.core_type = #tpu.core_type<tc>} {
    %c0 = arith.constant 0 : index
    %c0_0 = arith.constant 0 : index
    %0 = vector.load %arg0[%c0, %c0_0] : memref<16x32xf32, #tpu.memory_space<vmem>>, vector<16x32xf32>
    %c0_1 = arith.constant 0 : index
    %c0_2 = arith.constant 0 : index
    %1 = vector.load %arg1[%c0_1, %c0_2] : memref<32x96xf32, #tpu.memory_space<vmem>>, vector<32x96xf32>
    %cst = arith.constant dense<0.000000e+00> : vector<16x96xf32>
    %2 = tpu.matmul %0, %1, %cst {dimension_numbers = #tpu.dot_dimension_numbers<[1], [0], [0], [1], [0, 0, 1, 1], [], []>} : vector<16x32xf32>, vector<32x96xf32>, vector<16x96xf32> -> vector<16x96xf32>
    %c0_3 = arith.constant 0 : index
    %c0_4 = arith.constant 0 : index
    %3 = vector.load %arg2[%c0_3, %c0_4] : memref<1x96xf32, #tpu.memory_space<vmem>>, vector<1x96xf32>
    %4 = vector.broadcast %3 : vector<1x96xf32> to vector<16x96xf32>
    %5 = arith.addf %2, %4 : vector<16x96xf32>
    %6 = vector.shape_cast %5 : vector<16x96xf32> to vector<2x8x96xf32>
    %7 = tpu.transpose %6, [0, 2, 1] : vector<2x8x96xf32> -> vector<2x96x8xf32>
    %8 = vector.extract_strided_slice %7 {offsets = [0, 0, 0], sizes = [2, 32, 8], strides = [1, 1, 1]} : vector<2x96x8xf32> to vector<2x32x8xf32>
    %cst_5 = arith.constant 0.353553385 : f32
    %9 = vector.broadcast %cst_5 : f32 to vector<2x32x8xf32>
    %10 = arith.mulf %8, %9 : vector<2x32x8xf32>
    %11 = vector.extract_strided_slice %7 {offsets = [0, 32, 0], sizes = [2, 32, 8], strides = [1, 1, 1]} : vector<2x96x8xf32> to vector<2x32x8xf32>
    %12 = vector.extract_strided_slice %7 {offsets = [0, 64, 0], sizes = [2, 32, 8], strides = [1, 1, 1]} : vector<2x96x8xf32> to vector<2x32x8xf32>
    %13 = vector.shape_cast %10 : vector<2x32x8xf32> to vector<8x8x8xf32>
    %14 = tpu.transpose %13, [0, 2, 1] : vector<8x8x8xf32> -> vector<8x8x8xf32>
    %15 = vector.shape_cast %11 : vector<2x32x8xf32> to vector<8x8x8xf32>
    %16 = vector.shape_cast %12 : vector<2x32x8xf32> to vector<8x8x8xf32>
    "tpu.trace_start"() <{level = 10 : i32, message = "xsd,xdt->xst"}> : () -> ()
    %cst_6 = arith.constant dense<0.000000e+00> : vector<8x8x8xf32>
    %17 = tpu.matmul %14, %15, %cst_6 {dimension_numbers = #tpu.dot_dimension_numbers<[2], [1], [1], [2], [0, 0, 0, 1, 1, 2], [0], [0]>} : vector<8x8x8xf32>, vector<8x8x8xf32>, vector<8x8x8xf32> -> vector<8x8x8xf32>
    "tpu.trace_stop"() : () -> ()
    %cst_7 = arith.constant dense<0xFF800000> : vector<8x8xf32>
    %18 = vector.multi_reduction <maximumf>, %17, %cst_7 [2] : vector<8x8x8xf32> to vector<8x8xf32>
    %19 = vector.shape_cast %18 : vector<8x8xf32> to vector<8x8x1xf32>
    %20 = vector.broadcast %19 : vector<8x8x1xf32> to vector<8x8x8xf32>
    %21 = arith.subf %17, %20 : vector<8x8x8xf32>
    %22 = math.exp %21 : vector<8x8x8xf32>
    %cst_8 = arith.constant dense<0.000000e+00> : vector<8x8xf32>
    %23 = vector.multi_reduction <add>, %22, %cst_8 [2] : vector<8x8x8xf32> to vector<8x8xf32>
    %24 = vector.shape_cast %23 : vector<8x8xf32> to vector<8x8x1xf32>
    %25 = vector.broadcast %24 : vector<8x8x1xf32> to vector<8x8x8xf32>
    %26 = arith.divf %22, %25 : vector<8x8x8xf32>
    %27 = vector.shape_cast %26 : vector<8x8x8xf32> to vector<8x64xf32>
    %c0_9 = arith.constant 0 : index
    %c0_10 = arith.constant 0 : index
    %28 = vector.load %arg14[%c0_9, %c0_10] : memref<8x64xf32, #tpu.memory_space<vmem>>, vector<8x64xf32>
    tpu.vector_store %arg14[%c0_9, %c0_10], %27 {strides = array<i32>} : memref<8x64xf32, #tpu.memory_space<vmem>>, vector<8x64xf32>,
    "tpu.trace_start"() <{level = 10 : i32, message = "xdt,xst->xds"}> : () -> ()
    %cst_11 = arith.constant dense<0.000000e+00> : vector<8x8x8xf32>
    %29 = tpu.matmul %16, %26, %cst_11 {dimension_numbers = #tpu.dot_dimension_numbers<[2], [2], [1], [1], [0, 0, 0, 1, 1, 1], [0], [0]>} : vector<8x8x8xf32>, vector<8x8x8xf32>, vector<8x8x8xf32> -> vector<8x8x8xf32>
    "tpu.trace_stop"() : () -> ()
    %30 = vector.shape_cast %29 : vector<8x8x8xf32> to vector<2x32x8xf32>
    %31 = tpu.transpose %30, [0, 2, 1] : vector<2x32x8xf32> -> vector<2x8x32xf32>
    %32 = vector.shape_cast %31 : vector<2x8x32xf32> to vector<16x32xf32>
    %c0_12 = arith.constant 0 : index
    %c0_13 = arith.constant 0 : index
    %33 = vector.load %arg3[%c0_12, %c0_13] : memref<32x32xf32, #tpu.memory_space<vmem>>, vector<32x32xf32>
    %cst_14 = arith.constant dense<0.000000e+00> : vector<16x32xf32>
    %34 = tpu.matmul %32, %33, %cst_14 {dimension_numbers = #tpu.dot_dimension_numbers<[1], [0], [0], [1], [0, 0, 1, 1], [], []>} : vector<16x32xf32>, vector<32x32xf32>, vector<16x32xf32> -> vector<16x32xf32>
    %c0_15 = arith.constant 0 : index
    %c0_16 = arith.constant 0 : index
    %35 = vector.load %arg4[%c0_15, %c0_16] : memref<1x32xf32, #tpu.memory_space<vmem>>, vector<1x32xf32>
    %36 = vector.broadcast %35 : vector<1x32xf32> to vector<16x32xf32>
    %37 = arith.addf %34, %36 : vector<16x32xf32>
    %38 = arith.addf %37, %0 : vector<16x32xf32>
    %c0_17 = arith.constant 0 : index
    %c0_18 = arith.constant 0 : index
    %39 = vector.load %arg5[%c0_17, %c0_18] : memref<1x32xf32, #tpu.memory_space<vmem>>, vector<1x32xf32>
    %c0_19 = arith.constant 0 : index
    %c0_20 = arith.constant 0 : index
    %40 = vector.load %arg6[%c0_19, %c0_20] : memref<1x32xf32, #tpu.memory_space<vmem>>, vector<1x32xf32>
    %cst_21 = arith.constant dense<0.000000e+00> : vector<16xf32>
    %41 = vector.multi_reduction <add>, %38, %cst_21 [1] : vector<16x32xf32> to vector<16xf32>
    %42 = vector.shape_cast %41 : vector<16xf32> to vector<16x1xf32>
    %cst_22 = arith.constant 3.200000e+01 : f32
    %43 = vector.broadcast %cst_22 : f32 to vector<16x1xf32>
    %44 = arith.divf %42, %43 : vector<16x1xf32>
    %45 = vector.broadcast %44 : vector<16x1xf32> to vector<16x32xf32>
    %46 = arith.subf %38, %45 : vector<16x32xf32>
    %47 = arith.mulf %46, %46 : vector<16x32xf32>
    %cst_23 = arith.constant dense<0.000000e+00> : vector<16xf32>
    %48 = vector.multi_reduction <add>, %47, %cst_23 [1] : vector<16x32xf32> to vector<16xf32>
    %49 = vector.shape_cast %48 : vector<16xf32> to vector<16x1xf32>
    %cst_24 = arith.constant 3.200000e+01 : f32
    %50 = vector.broadcast %cst_24 : f32 to vector<16x1xf32>
    %51 = arith.divf %49, %50 : vector<16x1xf32>
    %52 = vector.broadcast %44 : vector<16x1xf32> to vector<16x32xf32>
    %53 = arith.subf %38, %52 : vector<16x32xf32>
    %cst_25 = arith.constant 9.99999996E-13 : f32
    %54 = vector.broadcast %cst_25 : f32 to vector<16x1xf32>
    %55 = arith.addf %51, %54 : vector<16x1xf32>
    %56 = math.rsqrt %55 : vector<16x1xf32>
    %57 = vector.broadcast %56 : vector<16x1xf32> to vector<16x32xf32>
    %58 = arith.mulf %53, %57 : vector<16x32xf32>
    %59 = vector.broadcast %39 : vector<1x32xf32> to vector<16x32xf32>
    %60 = arith.mulf %58, %59 : vector<16x32xf32>
    %61 = vector.broadcast %40 : vector<1x32xf32> to vector<16x32xf32>
    %62 = arith.addf %60, %61 : vector<16x32xf32>
    %c0_26 = arith.constant 0 : index
    %c0_27 = arith.constant 0 : index
    %63 = vector.load %arg15[%c0_26, %c0_27] : memref<16x32xf32, #tpu.memory_space<vmem>>, vector<16x32xf32>
    tpu.vector_store %arg15[%c0_26, %c0_27], %62 {strides = array<i32>} : memref<16x32xf32, #tpu.memory_space<vmem>>, vector<16x32xf32>,
    %c0_28 = arith.constant 0 : index
    %c0_29 = arith.constant 0 : index
    %64 = vector.load %arg7[%c0_28, %c0_29] : memref<32x128xf32, #tpu.memory_space<vmem>>, vector<32x128xf32>
    %cst_30 = arith.constant dense<0.000000e+00> : vector<16x128xf32>
    %65 = tpu.matmul %62, %64, %cst_30 {dimension_numbers = #tpu.dot_dimension_numbers<[1], [0], [0], [1], [0, 0, 1, 1], [], []>} : vector<16x32xf32>, vector<32x128xf32>, vector<16x128xf32> -> vector<16x128xf32>
    %c0_31 = arith.constant 0 : index
    %c0_32 = arith.constant 0 : index
    %66 = vector.load %arg8[%c0_31, %c0_32] : memref<1x128xf32, #tpu.memory_space<vmem>>, vector<1x128xf32>
    %67 = vector.broadcast %66 : vector<1x128xf32> to vector<16x128xf32>
    %68 = arith.addf %65, %67 : vector<16x128xf32>
    %cst_33 = arith.constant 5.000000e-01 : f32
    %69 = vector.broadcast %cst_33 : f32 to vector<16x128xf32>
    %70 = arith.mulf %69, %68 : vector<16x128xf32>
    %cst_34 = arith.constant 0.707106769 : f32
    %71 = vector.broadcast %cst_34 : f32 to vector<16x128xf32>
    %72 = arith.mulf %68, %71 : vector<16x128xf32>
    %73 = math.erf %72 : vector<16x128xf32>
    %cst_35 = arith.constant 1.000000e+00 : f32
    %74 = vector.broadcast %cst_35 : f32 to vector<16x128xf32>
    %75 = arith.addf %74, %73 : vector<16x128xf32>
    %76 = arith.mulf %70, %75 : vector<16x128xf32>
    %c0_36 = arith.constant 0 : index
    %c0_37 = arith.constant 0 : index
    %77 = vector.load %arg9[%c0_36, %c0_37] : memref<128x32xf32, #tpu.memory_space<vmem>>, vector<128x32xf32>
    %cst_38 = arith.constant dense<0.000000e+00> : vector<16x32xf32>
    %78 = tpu.matmul %76, %77, %cst_38 {dimension_numbers = #tpu.dot_dimension_numbers<[1], [0], [0], [1], [0, 0, 1, 1], [], []>} : vector<16x128xf32>, vector<128x32xf32>, vector<16x32xf32> -> vector<16x32xf32>
    %c0_39 = arith.constant 0 : index
    %c0_40 = arith.constant 0 : index
    %79 = vector.load %arg10[%c0_39, %c0_40] : memref<1x32xf32, #tpu.memory_space<vmem>>, vector<1x32xf32>
    %80 = vector.broadcast %79 : vector<1x32xf32> to vector<16x32xf32>
    %81 = arith.addf %78, %80 : vector<16x32xf32>
    %82 = arith.addf %81, %62 : vector<16x32xf32>
    %c0_41 = arith.constant 0 : index
    %c0_42 = arith.constant 0 : index
    %83 = vector.load %arg11[%c0_41, %c0_42] : memref<1x32xf32, #tpu.memory_space<vmem>>, vector<1x32xf32>
    %c0_43 = arith.constant 0 : index
    %c0_44 = arith.constant 0 : index
    %84 = vector.load %arg12[%c0_43, %c0_44] : memref<1x32xf32, #tpu.memory_space<vmem>>, vector<1x32xf32>
    %cst_45 = arith.constant dense<0.000000e+00> : vector<16xf32>
    %85 = vector.multi_reduction <add>, %82, %cst_45 [1] : vector<16x32xf32> to vector<16xf32>
    %86 = vector.shape_cast %85 : vector<16xf32> to vector<16x1xf32>
    %cst_46 = arith.constant 3.200000e+01 : f32
    %87 = vector.broadcast %cst_46 : f32 to vector<16x1xf32>
    %88 = arith.divf %86, %87 : vector<16x1xf32>
    %89 = vector.broadcast %88 : vector<16x1xf32> to vector<16x32xf32>
    %90 = arith.subf %82, %89 : vector<16x32xf32>
    %91 = arith.mulf %90, %90 : vector<16x32xf32>
    %cst_47 = arith.constant dense<0.000000e+00> : vector<16xf32>
    %92 = vector.multi_reduction <add>, %91, %cst_47 [1] : vector<16x32xf32> to vector<16xf32>
    %93 = vector.shape_cast %92 : vector<16xf32> to vector<16x1xf32>
    %cst_48 = arith.constant 3.200000e+01 : f32
    %94 = vector.broadcast %cst_48 : f32 to vector<16x1xf32>
    %95 = arith.divf %93, %94 : vector<16x1xf32>
    %96 = vector.broadcast %88 : vector<16x1xf32> to vector<16x32xf32>
    %97 = arith.subf %82, %96 : vector<16x32xf32>
    %cst_49 = arith.constant 9.99999996E-13 : f32
    %98 = vector.broadcast %cst_49 : f32 to vector<16x1xf32>
    %99 = arith.addf %95, %98 : vector<16x1xf32>
    %100 = math.rsqrt %99 : vector<16x1xf32>
    %101 = vector.broadcast %100 : vector<16x1xf32> to vector<16x32xf32>
    %102 = arith.mulf %97, %101 : vector<16x32xf32>
    %103 = vector.broadcast %83 : vector<1x32xf32> to vector<16x32xf32>
    %104 = arith.mulf %102, %103 : vector<16x32xf32>
    %105 = vector.broadcast %84 : vector<1x32xf32> to vector<16x32xf32>
    %106 = arith.addf %104, %105 : vector<16x32xf32>
    %c0_50 = arith.constant 0 : index
    %c0_51 = arith.constant 0 : index
    %107 = vector.load %arg13[%c0_50, %c0_51] : memref<16x32xf32, #tpu.memory_space<vmem>>, vector<16x32xf32>
    tpu.vector_store %arg13[%c0_50, %c0_51], %106 {strides = array<i32>} : memref<16x32xf32, #tpu.memory_space<vmem>>, vector<16x32xf32>,
    return
  }
}

</mosaic_0001>

<bundles_post_ra>
// kernel: tpu_custom_call.1
= control target key start
LH: loop header
LB: loop body
LE: loop exit
PB: predicated region body
PF: predicated region fallthrough
CT: control target
= control target key end

     0   :  { %21 = vsyncpa [#allocation3], 0  ;;  %s2268_s0 = inlined_call_operand.vmem [shape: f32[16,32], index: 0, kind: input, shape index: {}]   ;;  %s2269_s1 = inlined_call_operand.vmem [shape: f32[32,96], index: 1, kind: input, shape index: {}]   ;;  %s2270_s2 = inlined_call_operand.vmem [shape: f32[1,96], index: 2, kind: input, shape index: {}]   ;;  %s2271_s3 = inlined_call_operand.vmem [shape: f32[32,32], index: 3, kind: input, shape index: {}]   ;;  %s2272_s4 = inlined_call_operand.vmem [shape: f32[1,32], index: 4, kind: input, shape index: {}]   ;;  %s2273_s5 = inlined_call_operand.vmem [shape: f32[1,32], index: 5, kind: input, shape index: {}]   ;;  %s2274_s6 = inlined_call_operand.vmem [shape: f32[1,32], index: 6, kind: input, shape index: {}]   ;;  %s2275_s7 = inlined_call_operand.vmem [shape: f32[32,128], index: 7, kind: input, shape index: {}]   ;;  %s2276_s8 = inlined_call_operand.vmem [shape: f32[1,128], index: 8, kind: input, shape index: {}]   ;;  %s2277_s9 = inlined_call_operand.vmem [shape: f32[128,32], index: 9, kind: input, shape index: {}]   ;;  %s2278_s10 = inlined_call_operand.vmem [shape: f32[1,32], index: 10, kind: input, shape index: {}]   ;;  %s2279_s11 = inlined_call_operand.vmem [shape: f32[1,32], index: 11, kind: input, shape index: {}]   ;;  %s2280_s12 = inlined_call_operand.vmem [shape: f32[1,32], index: 12, kind: input, shape index: {}]   ;;  %s2281_s13 = inlined_call_operand.hbm [shape: f32[16,32], index: 13, kind: output, shape index: {0}]   ;;  %s2282_s14 = inlined_call_operand.hbm [shape: f32[8,64], index: 14, kind: output, shape index: {1}]   ;;  %s2283_s15 = inlined_call_operand.hbm [shape: f32[16,32], index: 15, kind: output, shape index: {2}]  }
   0x1   :  { %v54_v0 = vld [vmem:[%s2269_s1 + $0x18] sm:$0xff]  ;;  %v53_v1 = vld [vmem:[%s2269_s1 + $0x10] sm:$0xff]  ;;  %v52_v2 = vld [vmem:[%s2269_s1 + $0x8] sm:$0xff] }
   0x2   :  { %78 = vmatpush.msra.mxu0 %v54_v0  ;;  %v51_v3 = vld [vmem:[%s2269_s1] sm:$0xff] }
   0x4   :  { %79 = vmatpush.msra.mxu0 %v53_v1 }
   0x5   :  { %22 = vsyncpa [#allocation5], 0  ;;  %v1890_v4 = vld [vmem:[%s2268_s0] sm:$0xff]  ;;  %vm59_vm0 = vcmask 261120   ;;  %v1897_v5 = vld [vmem:[%s2268_s0 + $0x8] sm:$0xff]  ;;  %vm417_vm1 = vcmask 64512  }
   0x6   :  { %80 = vmatpush.msra.mxu0 %v52_v2  ;;  %v1651_v6 = vld [vmem:[%s2270_s2] ss:$0 sm:$0xff]  ;;  %vm795_vm10 = vcmask 1047556   ;;  %s1783_s22 = smov 8   ;;  %s1784_s23 = smov 16  }
   0x7   :  { %s1788_s26 = smov 40   ;;  %s1789_s29 = smov 48  }
   0x8   :  { %81 = vmatpush.msra.mxu0 %v51_v3  ;;  %s1559_s24 = sshll.u32 %s2281_s13, 4  ;;  %s1560_s24 = int_to_ptr.hbm [resolvable:$true] %s1559_s24 }
   0x9   :  { %1604 = vmatmul.msk.f32.vlgmr.msra.gmra.mxu0 %vm59_vm0, %v1890_v4 }
  0x11   :  { %1605 = vmatmul.msk.f32.gmra.mxu0 %vm59_vm0, %v1897_v5 }
  0x86   :  { %v83_v7 = vpop.f32.mrf.mxu0 }
  0x87   :  { %v84_v8 = vadd.f32 %v1651_v6, %v83_v7 }
  0x89   :  { %89 = vxpose.xlu0.b32.start.end [1/1] (short) (narrow) %v84_v8, 96 }
  0x8e   :  { %v86_v9 = vpop.f32.mrf.mxu0 }
  0x8f   :  { %v87_v10 = vadd.f32 %v1651_v6, %v86_v9 }
  0x91   :  { %121 = vxpose.xlu1.b32.start.end [1/1] (short) (narrow) %v87_v10, 96 }
 0x12d   :  { %v105_v11 = vpop.trf.xlu0 }
 0x12e   :  { %v153_v12 = vmul.f32 0.35355338, %v105_v11 }
 0x130   :  { %161 = vxpose.xlu0.b32.start.end [1/1] (short) (narrow) %v153_v12, 8 }
 0x135   :  { %v137_v13 = vpop.trf.xlu1  ;;  %v106_v14 = vpop.trf.xlu0 }
 0x136   :  { %v154_v15 = vmul.f32 0.35355338, %v106_v14  ;;  %v157_v16 = vmul.f32 0.35355338, %v137_v13 }
 0x138   :  { %289 = vxpose.xlu2.b32.start.end [1/1] (short) (narrow) %v157_v16, 8  ;;  %193 = vxpose.xlu1.b32.start.end [1/1] (short) (narrow) %v154_v15, 8 }
 0x13d   :  { %v107_v17 = vpop.trf.xlu0  ;;  %v138_v18 = vpop.trf.xlu1 }
 0x13e   :  { %v155_v19 = vmul.f32 0.35355338, %v107_v17  ;;  %v158_v20 = vmul.f32 0.35355338, %v138_v18 }
 0x140   :  { %225 = vxpose.xlu2.b32.start.end [1/1] (short) (narrow) %v155_v19, 8 }
 0x145   :  { %v108_v21 = vpop.trf.xlu0  ;;  %v139_v22 = vpop.trf.xlu1 }
 0x146   :  { %v156_v23 = vmul.f32 0.35355338, %v108_v21  ;;  %v159_v26 = vmul.f32 0.35355338, %v139_v22 }
 0x148   :  { %321 = vxpose.xlu2.b32.start.end [1/1] (short) (narrow) %v158_v20, 8 }
 0x14d   :  { %v140_v24 = vpop.trf.xlu1  ;;  %v109_v25 = vpop.trf.xlu0 }
 0x14e   :  { %436 = vmatpush.msra.mxu2 %v109_v25  ;;  %v160_v29 = vmul.f32 0.35355338, %v140_v24 }
 0x150   :  { %257 = vxpose.xlu2.b32.start.end [1/1] (short) (narrow) %v156_v23, 8 }
 0x155   :  { %v141_v27 = vpop.trf.xlu1  ;;  %v110_v28 = vpop.trf.xlu0 }
 0x156   :  { %459 = vmatpush.msrb.mxu2 %v110_v28 }
 0x158   :  { %353 = vxpose.xlu2.b32.start.end [1/1] (short) (narrow) %v159_v26, 8 }
 0x15d   :  { %v142_v30 = vpop.trf.xlu1  ;;  %v111_v31 = vpop.trf.xlu0 }
 0x15e   :  { %482 = vmatpush.msra.mxu3 %v111_v31 }
 0x160   :  { %551 = vmatpush.msrb.mxu3 %v142_v30  ;;  %385 = vxpose.xlu2.b32.start.end [1/1] (short) (narrow) %v160_v29, 8 }
 0x165   :  { %v143_v32 = vpop.trf.xlu1  ;;  %v112_v33 = vpop.trf.xlu0 }
 0x166   :  { %574 = vmatpush.msra.mxu1 %v143_v32 }
 0x16d   :  { %v144_v34 = vpop.trf.xlu1  ;;  %v1904_v35 = vpop.trf.xlu0 }
 0x175   :  { %v1906_v36 = vpop.trf.xlu1  ;;  %v1908_v37 = vpop.trf.xlu0 }
 0x17d   :  { %v1910_v38 = vpop.trf.xlu1  ;;  %v1912_v39 = vpop.trf.xlu0 }
 0x185   :  { %v1914_v40 = vpop.trf.xlu1  ;;  %v1916_v41 = vpop.trf.xlu0 }
 0x18d   :  { %v1918_v43 = vpop.trf.xlu1 }
 0x1d1   :  { %v305_v42 = vpop.trf.xlu2 }
 0x1d4   :  { %v177_v44 = vpop.trf.xlu0 }
 0x1d5   :  { %1606 = vmatmul.msk.f32.vlgmr.msra.gmra.mxu2 %vm417_vm1, %v177_v44 }
 0x1d6   :  { %505 = vmatpush.msra.mxu2 %v112_v33 }
 0x1d9   :  { %v241_v45 = vpop.trf.xlu2 }
 0x1da   :  { %1608 = vmatmul.msk.f32.vlgmr.msra.gmra.mxu3 %vm417_vm1, %v241_v45 }
 0x1dc   :  { %v209_v46 = vpop.trf.xlu1 }
 0x1dd   :  { %1607 = vmatmul.msk.f32.vlgmr.msrb.gmra.mxu2 %vm417_vm1, %v209_v46 }
 0x1de   :  { %528 = vmatpush.msrb.mxu2 %v141_v27 }
 0x1e1   :  { %v337_v47 = vpop.trf.xlu2 }
 0x1e2   :  { %1611 = vmatmul.msk.f32.vlgmr.msrb.gmra.mxu3 %vm417_vm1, %v337_v47 }
 0x1e9   :  { %v273_v48 = vpop.trf.xlu2 }
 0x1ea   :  { %1609 = vmatmul.msk.f32.vlgmr.msra.gmra.mxu2 %vm417_vm1, %v273_v48 }
 0x1eb   :  { %597 = vmatpush.msra.mxu2 %v144_v34 }
 0x1f1   :  { %v369_v49 = vpop.trf.xlu2 }
 0x1f2   :  { %1610 = vmatmul.msk.f32.vlgmr.msrb.gmra.mxu2 %vm417_vm1, %v305_v42  ;;  %1612 = vmatmul.msk.f32.vlgmr.msra.gmra.mxu1 %vm417_vm1, %v369_v49 }
 0x1f9   :  { %v401_v50 = vpop.trf.xlu2 }
 0x1fa   :  { %1613 = vmatmul.msk.f32.vlgmr.msra.gmra.mxu2 %vm417_vm1, %v401_v50 }
 0x258   :  { %v438_v51 = vpop.f32.mrf.mxu2 }
 0x259   :  { %v602_v52 = vsel %vm417_vm1, %v438_v51, -inf }
 0x25a   :  { %603 = vmax.xlane.f32.xlu2 %v602_v52 }
 0x25d   :  { %v484_v53 = vpop.f32.mrf.mxu3 }
 0x25e   :  { %v608_v54 = vsel %vm417_vm1, %v484_v53, -inf }
 0x25f   :  { %609 = vmax.xlane.f32.xlu0 %v608_v54 }
 0x260   :  { %v461_v55 = vpop.f32.mrf.mxu2 }
 0x261   :  { %v605_v56 = vsel %vm417_vm1, %v461_v55, -inf }
 0x262   :  { %606 = vmax.xlane.f32.xlu2 %v605_v56 }
 0x265   :  { %v553_v59 = vpop.f32.mrf.mxu3 }
 0x266   :  { %v617_v61 = vsel %vm417_vm1, %v553_v59, -inf }
 0x26d   :  { %v507_v57 = vpop.f32.mrf.mxu2 }
 0x26e   :  { %v611_v58 = vsel %vm417_vm1, %v507_v57, -inf }
 0x26f   :  { %612 = vmax.xlane.f32.xlu2 %v611_v58  ;;  %v576_v1 = vpop.f32.mrf.mxu1 }
 0x270   :  { %v620_v2 = vsel %vm417_vm1, %v576_v1, -inf }
 0x275   :  { %v530_v60 = vpop.f32.mrf.mxu2 }
 0x276   :  { %v614_v62 = vsel %vm417_vm1, %v530_v60, -inf }
 0x277   :  { %618 = vmax.xlane.f32.xlu2 %v617_v61  ;;  %615 = vmax.xlane.f32.xlu1 %v614_v62 }
 0x27d   :  { %v599_v63 = vpop.f32.mrf.mxu2 }
 0x27e   :  { %v623_v0 = vsel %vm417_vm1, %v599_v63, -inf }
 0x27f   :  { %624 = vmax.xlane.f32.xlu2 %v623_v0 }
 0x287   :  { %621 = vmax.xlane.f32.xlu2 %v620_v2 }
 0x2cd   :  { %v604_v3 = vpop.xlane.xlu2 %603 }
 0x2ce   :  { %v626_v6 = vsub.f32 %v438_v51, %v604_v3 }
 0x2d0   :  { %v634_v7 = vmul.f32 1.442695, %v626_v6 }
 0x2d2   :  { %1659 = vpow2.f32 %v634_v7  ;;  %v610_v8 = vpop.xlane.xlu0 %609 }
 0x2d3   :  { %v628_v9 = vsub.f32 %v484_v53, %v610_v8 }
 0x2d5   :  { %v638_v10 = vmul.f32 1.442695, %v628_v9  ;;  %v607_v11 = vpop.xlane.xlu2 %606 }
 0x2d6   :  { %v627_v12 = vsub.f32 %v461_v55, %v607_v11  ;;  %v1781_v11 = vmov 1983009808  }
 0x2d7   :  { %1661 = vpow2.f32 %v638_v10 }
 0x2d8   :  { %v1936_v13 = vpop.eup %1659  ;;  %v636_v14 = vmul.f32 1.442695, %v627_v12  ;;  %v800_v12 = vunpack.c.l.s4 %v1781_v11 }
 0x2d9   :  { %v650_v15 = vsel %vm417_vm1, %v1936_v13, 0.0 }
 0x2da   :  { %651 = vadd.xlane.f32.xlu1 %v650_v15  ;;  %1663 = vpow2.f32 %v636_v14 }
 0x2dd   :  { %v1940_v16 = vpop.eup %1661 }
 0x2de   :  { %v656_v17 = vsel %vm417_vm1, %v1940_v16, 0.0 }
 0x2df   :  { %657 = vadd.xlane.f32.xlu2 %v656_v17 }
 0x2e0   :  { %v1944_v19 = vpop.eup %1663 }
 0x2e1   :  { %v653_v20 = vsel %vm417_vm1, %v1944_v19, 0.0 }
 0x2e2   :  { %v613_v18 = vpop.xlane.xlu2 %612 }
 0x2e3   :  { %v629_v27 = vsub.f32 %v507_v57, %v613_v18 }
 0x2e5   :  { %v640_v28 = vmul.f32 1.442695, %v629_v27 }
 0x2e7   :  { %654 = vadd.xlane.f32.xlu2 %v653_v20 }
 0x2ea   :  { %v619_v21 = vpop.xlane.xlu2 %618  ;;  %v616_v22 = vpop.xlane.xlu1 %615 }
 0x2eb   :  { %v631_v23 = vsub.f32 %v553_v59, %v619_v21  ;;  %v630_v24 = vsub.f32 %v530_v60, %v616_v22  ;;  %v1970_v22 = vunpack.c.0.s8 %v800_v12 }
 0x2ed   :  { %v644_v25 = vmul.f32 1.442695, %v631_v23  ;;  %v642_v26 = vmul.f32 1.442695, %v630_v24 }
 0x2ef   :  { %1665 = vpow2.f32 %v644_v25 }
 0x2f0   :  { %1667 = vpow2.f32 %v642_v26 }
 0x2f1   :  { %1669 = vpow2.f32 %v640_v28 }
 0x2f2   :  { %v625_v29 = vpop.xlane.xlu2 %624 }
 0x2f3   :  { %v633_v30 = vsub.f32 %v599_v63, %v625_v29 }
 0x2f5   :  { %v1948_v31 = vpop.eup %1665  ;;  %v648_v32 = vmul.f32 1.442695, %v633_v30 }
 0x2f6   :  { %v1950_v33 = vpop.eup %1667  ;;  %v665_v34 = vsel %vm417_vm1, %v1948_v31, 0.0 }
 0x2f7   :  { %1671 = vpow2.f32 %v648_v32  ;;  %666 = vadd.xlane.f32.xlu0 %v665_v34  ;;  %v662_v42 = vsel %vm417_vm1, %v1950_v33, 0.0  ;;  %v1956_v46 = vpop.eup %1669 }
 0x2f8   :  { %663 = vadd.xlane.f32.xlu1 %v662_v42  ;;  %v659_v50 = vsel %vm417_vm1, %v1956_v46, 0.0 }
 0x2fa   :  { %v622_v44 = vpop.xlane.xlu2 %621 }
 0x2fb   :  { %v632_v45 = vsub.f32 %v576_v1, %v622_v44 }
 0x2fd   :  { %v1958_v47 = vpop.eup %1671  ;;  %v646_v48 = vmul.f32 1.442695, %v632_v45 }
 0x2fe   :  { %v671_v49 = vsel %vm417_vm1, %v1958_v47, 0.0 }
 0x2ff   :  { %1673 = vpow2.f32 %v646_v48  ;;  %672 = vadd.xlane.f32.xlu2 %v671_v49 }
 0x300   :  { %660 = vadd.xlane.f32.xlu1 %v659_v50 }
 0x305   :  { %v1964_v51 = vpop.eup %1673 }
 0x306   :  { %v668_v52 = vsel %vm417_vm1, %v1964_v51, 0.0 }
 0x308   :  { %669 = vadd.xlane.f32.xlu1 %v668_v52 }
 0x34d   :  { %v652_v53 = vpop.xlane.xlu1 %651 }
 0x34e   :  { %1675 = vrcp.f32 %v652_v53  ;;  %v685_v58 = vand.u32 2147483648, %v652_v53  ;;  %v683_v61 = vand.u32 2147483647, %v652_v53  ;;  %vm679_vm3 = vweird.f32 %v652_v53 }
 0x350   :  { %v686_v1 = vor.u32 1.1754944e-38, %v685_v58  ;;  %vm684_vm5 = vcmp.eq.f32.partialorder %v683_v61, 8.507059e+37 }
 0x352   :  { %v658_v54 = vpop.xlane.xlu2 %657 }
 0x353   :  { %1677 = vrcp.f32 %v658_v54  ;;  %v715_v6 = vand.u32 2147483648, %v658_v54  ;;  %v713_v9 = vand.u32 2147483647, %v658_v54  ;;  %vm709_vm7 = vweird.f32 %v658_v54 }
 0x354   :  { %v1676_v55 = vpop.eup %1675 }
 0x355   :  { %v675_v56 = vmul.f32 %v1676_v55, %v652_v53  ;;  %vm680_vm2 = vweird.f32 %v1676_v55  ;;  %v716_v17 = vor.u32 1.1754944e-38, %v715_v6  ;;  %vm714_vm9 = vcmp.eq.f32.partialorder %v713_v9, 8.507059e+37 }
 0x356   :  { %vm681_vm4 = vmor %vm679_vm3, %vm680_vm2 }
 0x357   :  { %v676_v57 = vsub.f32 1.0, %v675_v56 }
 0x359   :  { %v1678_v59 = vpop.eup %1677  ;;  %v677_v60 = vmul.f32 %v1676_v55, %v676_v57 }
 0x35a   :  { %v705_v62 = vmul.f32 %v1678_v59, %v658_v54  ;;  %v655_v63 = vpop.xlane.xlu2 %654  ;;  %vm710_vm6 = vweird.f32 %v1678_v59 }
 0x35b   :  { %v678_v0 = vadd.f32 %v1676_v55, %v677_v60  ;;  %1679 = vrcp.f32 %v655_v63  ;;  %vm711_vm8 = vmor %vm709_vm7, %vm710_vm6  ;;  %v700_v28 = vand.u32 2147483648, %v655_v63  ;;  %vm694_vm12 = vweird.f32 %v655_v63 }
 0x35c   :  { %v706_v2 = vsub.f32 1.0, %v705_v62  ;;  %v698_v32 = vand.u32 2147483647, %v655_v63 }
 0x35d   :  { %v682_v3 = vsel %vm681_vm4, %v1676_v55, %v678_v0  ;;  %v701_v42 = vor.u32 1.1754944e-38, %v700_v28 }
 0x35e   :  { %v687_v7 = vsel %vm684_vm5, %v686_v1, %v682_v3  ;;  %v707_v8 = vmul.f32 %v1678_v59, %v706_v2  ;;  %vm699_vm14 = vcmp.eq.f32.partialorder %v698_v32, 8.507059e+37 }
 0x35f   :  { %v688_v10 = vmul.f32 %v1936_v13, %v687_v7 }
 0x360   :  { %v708_v14 = vadd.f32 %v1678_v59, %v707_v8 }
 0x361   :  { %v1680_v15 = vpop.eup %1679  ;;  %1614 = vmatpush.xpose.msk.msra.mxu3 %vm417_vm1, %v688_v10  ;;  %v797_v24 = vrot.slane %v688_v10, 4 }
 0x362   :  { %v712_v18 = vsel %vm711_vm8, %v1678_v59, %v708_v14  ;;  %v690_v20 = vmul.f32 %v1680_v15, %v655_v63  ;;  %vm695_vm11 = vweird.f32 %v1680_v15 }
 0x363   :  { %v717_v21 = vsel %vm714_vm9, %v716_v17, %v712_v18  ;;  %vm696_vm13 = vmor %vm694_vm12, %vm695_vm11 }
 0x364   :  { %v691_v23 = vsub.f32 1.0, %v690_v20  ;;  %1615 = vmatmul.msk.f32.vlgmr.msra.gmra.mxu3 %vm417_vm1, %v1904_v35  ;;  %v718_v13 = vmul.f32 %v1940_v16, %v717_v21 }
 0x366   :  { %v692_v25 = vmul.f32 %v1680_v15, %v691_v23  ;;  %v794_v26 = vrot.slane %v718_v13, 4  ;;  %1618 = vmatpush.xpose.msk.msrb.mxu3 %vm417_vm1, %v718_v13  ;;  %v798_v27 = vsel %vm795_vm10, %v718_v13, %v797_v24 }
 0x367   :  { %v1978_v29 = vperm.slane %v798_v27, %v1970_v22 }
 0x368   :  { %v693_v30 = vadd.f32 %v1680_v15, %v692_v25  ;;  %v1981_v34 = vsel %vm795_vm10, %v794_v26, %v688_v10 }
 0x36a   :  { %v667_v35 = vpop.xlane.xlu0 %666  ;;  %v697_v16 = vsel %vm696_vm13, %v1680_v15, %v693_v30 }
 0x36b   :  { %v664_v44 = vpop.xlane.xlu1 %663  ;;  %1681 = vrcp.f32 %v667_v35  ;;  %v702_v45 = vsel %vm699_vm14, %v701_v42, %v697_v16  ;;  %v760_v56 = vand.u32 2147483648, %v667_v35  ;;  %v758_v59 = vand.u32 2147483647, %v667_v35 }
 0x36c   :  { %1683 = vrcp.f32 %v664_v44  ;;  %1619 = vmatmul.msk.f32.vlgmr.msrb.gmra.mxu3 %vm417_vm1, %v1912_v39  ;;  %v1986_v48 = vmul.f32 %v1944_v19, %v702_v45  ;;  %v745_v57 = vand.u32 2147483648, %v664_v44  ;;  %v743_v61 = vand.u32 2147483647, %v664_v44 }
 0x36d   :  { %vm754_vm3 = vweird.f32 %v667_v35  ;;  %vm739_vm4 = vweird.f32 %v664_v44  ;;  %v761_v0 = vor.u32 1.1754944e-38, %v760_v56  ;;  %vm759_vm7 = vcmp.eq.f32.partialorder %v758_v59, 8.507059e+37 }
 0x36e   :  { %1616 = vmatpush.xpose.msk.msrb.mxu0 %vm417_vm1, %v1986_v48  ;;  %v746_v2 = vor.u32 1.1754944e-38, %v745_v57  ;;  %vm744_vm8 = vcmp.eq.f32.partialorder %v743_v61, 8.507059e+37  ;;  %v857_v59 = vrot.slane %v1978_v29, 4 }
 0x371   :  { %v1682_v49 = vpop.eup %1681  ;;  %1617 = vmatmul.msk.f32.vlgmr.msrb.gmra.mxu0 %vm417_vm1, %v1908_v37 }
 0x372   :  { %v1684_v50 = vpop.eup %1683  ;;  %v750_v52 = vmul.f32 %v1682_v49, %v667_v35  ;;  %v1990_v53 = vpop.xlane.xlu2 %672  ;;  %vm755_vm15 = vweird.f32 %v1682_v49  ;;  %v802_v35 = vperm.slane %v1981_v34, %v1970_v22 }
 0x373   :  { %v735_v54 = vmul.f32 %v1684_v50, %v664_v44  ;;  %v1994_v55 = vpop.xlane.xlu1 %660  ;;  %1685 = vrcp.f32 %v1990_v53  ;;  %vm740_vm2 = vweird.f32 %v1684_v50  ;;  %vm756_vm5 = vmor %vm754_vm3, %vm755_vm15  ;;  %v790_v15 = vand.u32 2147483648, %v1990_v53 }
 0x374   :  { %v751_v39 = vsub.f32 1.0, %v750_v52  ;;  %1687 = vrcp.f32 %v1994_v55  ;;  %vm741_vm6 = vmor %vm739_vm4, %vm740_vm2  ;;  %v730_v20 = vand.u32 2147483648, %v1994_v55  ;;  %v788_v23 = vand.u32 2147483647, %v1990_v53 }
 0x375   :  { %v736_v19 = vsub.f32 1.0, %v735_v54  ;;  %v728_v13 = vand.u32 2147483647, %v1994_v55  ;;  %vm784_vm12 = vweird.f32 %v1990_v53  ;;  %vm724_vm13 = vweird.f32 %v1994_v55 }
 0x376   :  { %v752_v58 = vmul.f32 %v1682_v49, %v751_v39  ;;  %v791_v27 = vor.u32 1.1754944e-38, %v790_v15  ;;  %v731_v30 = vor.u32 1.1754944e-38, %v730_v20  ;;  %vm789_vm2 = vcmp.eq.f32.partialorder %v788_v23, 8.507059e+37 }
 0x377   :  { %v737_v60 = vmul.f32 %v1684_v50, %v736_v19  ;;  %vm729_vm3 = vcmp.eq.f32.partialorder %v728_v13, 8.507059e+37 }
 0x378   :  { %v753_v62 = vadd.f32 %v1682_v49, %v752_v58 }
 0x379   :  { %v1686_v63 = vpop.eup %1685  ;;  %v738_v37 = vadd.f32 %v1684_v50, %v737_v60 }
 0x37a   :  { %v1688_v1 = vpop.eup %1687  ;;  %v757_v3 = vsel %vm756_vm5, %v1682_v49, %v753_v62  ;;  %v780_v6 = vmul.f32 %v1686_v63, %v1990_v53  ;;  %vm785_vm9 = vweird.f32 %v1686_v63  ;;  %v809_v53 = vrot.slane %v1986_v48, 4 }
 0x37b   :  { %v742_v7 = vsel %vm741_vm6, %v1684_v50, %v738_v37  ;;  %v762_v8 = vsel %vm759_vm7, %v761_v0, %v757_v3  ;;  %v720_v9 = vmul.f32 %v1688_v1, %v1994_v55  ;;  %v2000_v10 = vpop.xlane.xlu1 %669  ;;  %vm725_vm11 = vweird.f32 %v1688_v1  ;;  %vm786_vm14 = vmor %vm784_vm12, %vm785_vm9 }
 0x37c   :  { %v747_v11 = vsel %vm744_vm8, %v746_v2, %v742_v7  ;;  %v781_v12 = vsub.f32 1.0, %v780_v6  ;;  %1689 = vrcp.f32 %v2000_v10  ;;  %v763_v18 = vmul.f32 %v1948_v31, %v762_v8  ;;  %vm726_vm15 = vmor %vm724_vm13, %vm725_vm11 }
 0x37d   :  { %v721_v14 = vsub.f32 1.0, %v720_v9  ;;  %v2005_v17 = vmul.f32 %v1950_v33, %v747_v11  ;;  %v1782_v33 = vmov 1934713408   ;;  %v775_v54 = vand.u32 2147483648, %v2000_v10 }
 0x37e   :  { %v782_v21 = vmul.f32 %v1686_v63, %v781_v12  ;;  %1624 = vmatpush.xpose.msk.msra.mxu0 %vm417_vm1, %v763_v18  ;;  %v848_v31 = vunpack.c.l.s4 %v1782_v33  ;;  %v833_v49 = vrot.slane %v763_v18, 4  ;;  %v773_v39 = vand.u32 2147483647, %v2000_v10 }
 0x37f   :  { %v722_v24 = vmul.f32 %v1688_v1, %v721_v14  ;;  %1622 = vmatpush.xpose.msk.msra.mxu3 %vm417_vm1, %v2005_v17  ;;  %vm769_vm5 = vweird.f32 %v2000_v10  ;;  %v845_v62 = vrot.slane %v802_v35, 4  ;;  %v821_v9 = vrot.slane %v2005_v17, 4 }
 0x380   :  { %v783_v25 = vadd.f32 %v1686_v63, %v782_v21  ;;  %v2024_v52 = vunpack.c.0.s8 %v848_v31  ;;  %vm774_vm7 = vcmp.eq.f32.partialorder %v773_v39, 8.507059e+37 }
 0x381   :  { %v723_v26 = vadd.f32 %v1688_v1, %v722_v24  ;;  %1625 = vmatmul.msk.f32.vlgmr.msra.gmra.mxu0 %vm417_vm1, %v1910_v38 }
 0x382   :  { %v1690_v28 = vpop.eup %1689  ;;  %v787_v32 = vsel %vm786_vm14, %v1686_v63, %v783_v25  ;;  %1623 = vmatmul.msk.f32.vlgmr.msra.gmra.mxu3 %vm417_vm1, %v1906_v36  ;;  %v776_v63 = vor.u32 1.1754944e-38, %v775_v54 }
 0x383   :  { %v727_v16 = vsel %vm726_vm15, %v1688_v1, %v723_v26  ;;  %v792_v42 = vsel %vm789_vm2, %v791_v27, %v787_v32  ;;  %v765_v44 = vmul.f32 %v1690_v28, %v2000_v10  ;;  %vm770_vm4 = vweird.f32 %v1690_v28 }
 0x384   :  { %v732_v45 = vsel %vm729_vm3, %v731_v30, %v727_v16  ;;  %v793_v50 = vmul.f32 %v1958_v47, %v792_v42  ;;  %vm771_vm6 = vmor %vm769_vm5, %vm770_vm4  ;;  %vm936_vm15 = vcmask 130048   ;;  %vm938_vm2 = vcmask 195584  }
 0x385   :  { %v766_v36 = vsub.f32 1.0, %v765_v44  ;;  %v733_v38 = vmul.f32 %v1956_v46, %v732_v45 }
 0x386   :  { %v831_v55 = vrot.slane %v793_v50, 4  ;;  %v834_v34 = vsel %vm795_vm10, %v793_v50, %v833_v49 }
 0x387   :  { %v767_v19 = vmul.f32 %v1690_v28, %v766_v36  ;;  %v807_v56 = vrot.slane %v733_v38, 4  ;;  %1620 = vmatpush.xpose.msk.msrb.mxu2 %vm417_vm1, %v733_v38  ;;  %v810_v47 = vsel %vm795_vm10, %v733_v38, %v809_v53  ;;  %v842_v57 = vperm.slane %v834_v34, %v1970_v22 }
 0x388   :  { %v832_v58 = vsel %vm795_vm10, %v831_v55, %v763_v18  ;;  %v818_v46 = vperm.slane %v810_v47, %v1970_v22 }
 0x389   :  { %v768_v60 = vadd.f32 %v1690_v28, %v767_v19  ;;  %v808_v61 = vsel %vm795_vm10, %v807_v56, %v1986_v48  ;;  %v838_v10 = vperm.slane %v832_v58, %v1970_v22 }
 0x38a   :  { %1621 = vmatmul.msk.f32.vlgmr.msrb.gmra.mxu2 %vm417_vm1, %v1916_v41  ;;  %v814_v37 = vperm.slane %v808_v61, %v1970_v22  ;;  %v855_v0 = vrot.slane %v818_v46, 4  ;;  %v858_v1 = vsel %vm795_vm10, %v818_v46, %v857_v59  ;;  %v1224_v59 = vld [vmem:[%s2271_s3 + $0x18] sm:$0xff]  ;;  %v1222_v61 = vld [vmem:[%s2271_s3 + $0x8] sm:$0xff] }
 0x38b   :  { %1628 = vmatpush.xpose.msk.msra.mxu2 %vm417_vm1, %v793_v50  ;;  %v772_v2 = vsel %vm771_vm6, %v1690_v28, %v768_v60  ;;  %v866_v3 = vperm.slane %v858_v1, %v2024_v52  ;;  %v867_v21 = vrot.slane %v838_v10, 4  ;;  %v1223_v60 = vld [vmem:[%s2271_s3 + $0x10] sm:$0xff]  ;;  %1247 = vmatpush.msrb.mxu3 %v1224_v59 }
 0x38c   :  { %v777_v6 = vsel %vm774_vm7, %v776_v63, %v772_v2  ;;  %v843_v7 = vrot.slane %v814_v37, 4  ;;  %v846_v48 = vsel %vm795_vm10, %v814_v37, %v845_v62  ;;  %v856_v8 = vsel %vm795_vm10, %v855_v0, %v1978_v29  ;;  %v1221_v62 = vld [vmem:[%s2271_s3] sm:$0xff]  ;;  %s1786_s3 = smov 24  }
 0x38d   :  { %v778_v41 = vmul.f32 %v1964_v51, %v777_v6  ;;  %v862_v11 = vperm.slane %v856_v8, %v2024_v52  ;;  %v879_v29 = vrot.slane %v842_v57, 4  ;;  %v854_v13 = vperm.slane %v846_v48, %v2024_v52  ;;  %1248 = vmatpush.msrb.mxu3 %v1223_v60  ;;  %v1652_v0 = vld [vmem:[%s2272_s4] ss:$0 sm:$0xff]  ;;  %s1787_s4 = smov 32  }
 0x38e   :  { %v844_v12 = vsel %vm795_vm10, %v843_v7, %v802_v35  ;;  %v905_v16 = vrot.slane %v866_v3, 4 }
 0x38f   :  { %v819_v14 = vrot.slane %v778_v41, 4  ;;  %v822_v15 = vsel %vm795_vm10, %v778_v41, %v821_v9  ;;  %1626 = vmatpush.xpose.msk.msrb.mxu1 %vm417_vm1, %v778_v41  ;;  %v850_v20 = vperm.slane %v844_v12, %v2024_v52  ;;  %v901_v31 = vrot.slane %v862_v11, 4  ;;  %1249 = vmatpush.msrb.mxu3 %v1222_v61 }
 0x390   :  { %v830_v18 = vperm.slane %v822_v15, %v1970_v22  ;;  %v897_v35 = vrot.slane %v854_v13, 4  ;;  %v1785_v9 = vmov 32.0  }
 0x391   :  { %v820_v51 = vsel %vm795_vm10, %v819_v14, %v2005_v17  ;;  %v893_v17 = vrot.slane %v850_v20, 4  ;;  %1250 = vmatpush.msrb.mxu3 %v1221_v62  ;;  %1691 = vrcp.f32 %v1785_v9 }
 0x392   :  { %v881_v23 = vrot.slane %v830_v18, 4  ;;  %1627 = vmatmul.msk.f32.vlgmr.msrb.gmra.mxu1 %vm417_vm1, %v1914_v40  ;;  %1629 = vmatmul.msk.f32.vlgmr.msra.gmra.mxu2 %vm417_vm1, %v1918_v43  ;;  %v826_v24 = vperm.slane %v820_v51, %v1970_v22  ;;  %v880_v25 = vsel %vm795_vm10, %v879_v29, %v830_v18 }
 0x393   :  { %v886_v33 = vperm.slane %v880_v25, %v2024_v52 }
 0x394   :  { %v868_v26 = vsel %vm795_vm10, %v867_v21, %v826_v24  ;;  %v869_v27 = vrot.slane %v826_v24, 4  ;;  %v882_v28 = vsel %vm795_vm10, %v842_v57, %v881_v23 }
 0x395   :  { %v874_v40 = vperm.slane %v868_v26, %v2024_v52  ;;  %v899_v30 = vrot.slane %v886_v33, 4  ;;  %v2073_v43 = vsel %vm795_vm10, %v886_v33, %v901_v31  ;;  %v890_v22 = vperm.slane %v882_v28, %v2024_v52  ;;  %v1328_v33 = vld [vmem:[%s2275_s7 + $0x18] sm:$0xff]  ;;  %v1327_v31 = vld [vmem:[%s2275_s7 + $0x10] sm:$0xff]  ;;  %v1326_v26 = vld [vmem:[%s2275_s7 + $0x8] sm:$0xff] }
 0x396   :  { %v870_v32 = vsel %vm795_vm10, %v838_v10, %v869_v27  ;;  %1351 = vmatpush.msrb.mxu0 %v1328_v33 }
 0x397   :  { %v894_v42 = vsel %vm795_vm10, %v874_v40, %v893_v17  ;;  %v891_v44 = vrot.slane %v874_v40, 4  ;;  %v878_v45 = vperm.slane %v870_v32, %v2024_v52  ;;  %v2080_v49 = vsel %vm795_vm10, %v899_v30, %v862_v11  ;;  %v1692_v10 = vpop.eup %1691  ;;  %v1325_v17 = vld [vmem:[%s2275_s7] sm:$0xff]  ;;  %s1573_s7 = sshll.u32 %s2282_s14, 4  ;;  %s1793_s14 = smov [#allocation2]   ;;  %s1574_s7 = int_to_ptr.hbm [resolvable:$true] %s1573_s7 }
 0x398   :  { %v903_v50 = vrot.slane %v890_v22, 4  ;;  %v2083_v53 = vsel %vm795_vm10, %v890_v22, %v905_v16  ;;  %v1269_v11 = vmul.f32 32.0, %v1692_v10  ;;  %1352 = vmatpush.msrb.mxu0 %v1327_v31  ;;  %s1557_s20 = sshll.u32 %s1793_s14, 4  ;;  %s1558_s20 = int_to_ptr.vmem [resolvable:$true] %s1557_s20 }
 0x399   :  { %v895_v36 = vrot.slane %v878_v45, 4  ;;  %v2086_v54 = vsel %vm795_vm10, %v891_v44, %v850_v20  ;;  %v2089_v38 = vsel %vm795_vm10, %v878_v45, %v897_v35 }
 0x39a   :  { %v2092_v55 = vsel %vm795_vm10, %v903_v50, %v866_v3  ;;  %v1270_v12 = vsub.f32 1.0, %v1269_v11  ;;  %1353 = vmatpush.msrb.mxu0 %v1326_v26  ;;  %v1455_v26 = vld [vmem:[%s2277_s9 + $0x28] sm:$0xff] }
 0x39b   :  { %v896_v34 = vsel %vm795_vm10, %v895_v36, %v854_v13  ;;  %vm1273_vm10 = vweird.f32 %v1692_v10  ;;  %v1653_v36 = vld [vmem:[%s2273_s5] ss:$0 sm:$0xff] }
 0x39c   :  { %v1271_v14 = vmul.f32 %v1692_v10, %v1270_v12  ;;  %1354 = vmatpush.msrb.mxu0 %v1325_v17  ;;  %v1460_v12 = vld [vmem:[%s2277_s9 + $0x50] sm:$0xff] }
 0x39e   :  { %v1272_v15 = vadd.f32 %v1692_v10, %v1271_v14 }
 0x3a0   :  { %v2117_v18 = vsel %vm1273_vm10, %v1692_v10, %v1272_v15  ;;  %v1461_v10 = vld [vmem:[%s2277_s9 + $0x58] sm:$0xff]  ;;  %v1459_v15 = vld [vmem:[%s2277_s9 + $0x48] sm:$0xff] }
 0x3e7   :  { %v972_v52 = vpop.f32.mrf.mxu3 }
 0x3e8   :  { %1157 = vxpose.xlu0.b32.start [1/4] (short) (narrow) %v972_v52, 8 }
 0x3ee   :  { %v998_v39 = vpop.f32.mrf.mxu0 }
 0x3ef   :  { %v1024_v19 = vpop.f32.mrf.mxu3 }
 0x3f0   :  { %1158 = vxpose.xlu0.b32.cont [2/4] (short) (narrow) %v998_v39, 8  ;;  %v1654_v39 = vld [vmem:[%s2274_s6] ss:$0 sm:$0xff]  ;;  %s1583_s6 = sshll.u32 %s2283_s15, 4  ;;  %s1794_s15 = smov 128   ;;  %s1584_s6 = int_to_ptr.hbm [resolvable:$true] %s1583_s6 }
 0x3f8   :  { %1159 = vxpose.xlu0.b32.cont [3/4] (short) (narrow) %v1024_v19, 8 }
 0x3fe   :  { %v1102_v47 = vpop.f32.mrf.mxu0 }
 0x405   :  { %v1076_v56 = vpop.f32.mrf.mxu3 }
 0x406   :  { %1189 = vxpose.xlu2.b32.start [1/4] (short) (narrow) %v1076_v56, 8 }
 0x40d   :  { %v1050_v57 = vpop.f32.mrf.mxu2 }
 0x40e   :  { %1160 = vxpose.xlu0.b32.end [4/4] (short) (narrow) %v1050_v57, 8  ;;  %1190 = vxpose.xlu2.b32.cont [2/4] (short) (narrow) %v1102_v47, 8 }
 0x40f   :  { %v1128_v58 = vpop.f32.mrf.mxu1 }
 0x415   :  { %v1154_v46 = vpop.f32.mrf.mxu2 }
 0x416   :  { %1191 = vxpose.xlu2.b32.cont [3/4] (short) (narrow) %v1128_v58, 8 }
 0x41e   :  { %1192 = vxpose.xlu2.b32.end [4/4] (short) (narrow) %v1154_v46, 8 }
 0x47c   :  { %908 = vrot.lane.b32.xlu0 %v894_v42, %s1783_s22 }
 0x487   :  { %912 = vrot.lane.b32.xlu2 %v896_v34, %s1784_s23 }
 0x49a   :  { %v1173_v63 = vpop.trf.xlu0 }
 0x49b   :  { %1630 = vmatmul.msk.f32.vlgmr.msrb.gmra.mxu3 %vm59_vm0, %v1173_v63 }
 0x49f   :  { %v1205_v37 = vpop.trf.xlu2 }
 0x4a3   :  { %1631 = vmatmul.msk.f32.gmra.mxu3 %vm59_vm0, %v1205_v37 }
 0x4e1   :  { %v913_v61 = vpop.permute.xlu2 %912 }
 0x4ee   :  { %v909_v47 = vpop.permute.xlu0 %908 }
 0x4ef   :  { %v935_v59 = vsel %vm417_vm1, %v2086_v54, %v909_v47 }
 0x4f0   :  { %v937_v37 = vsel %vm936_vm15, %v935_v59, %v913_v61 }
 0x51e   :  { %v1252_v1 = vpop.f32.mrf.mxu3 }
 0x51f   :  { %v1253_v2 = vadd.f32 %v1652_v0, %v1252_v1 }
 0x521   :  { %v1258_v3 = vadd.f32 %v1253_v2, %v1890_v4 }
 0x523   :  { %v1262_v6 = vsel %vm59_vm0, %v1258_v3, 0.0 }
 0x524   :  { %1263 = vadd.xlane.f32.xlu1 %v1262_v6  ;;  %v1465_v6 = vld [vmem:[%s2277_s9 + $0x78] sm:$0xff] }
 0x525   :  { %1470 = vmatpush.msra.mxu1 %v1465_v6 }
 0x526   :  { %v1255_v7 = vpop.f32.mrf.mxu3 }
 0x527   :  { %v1256_v48 = vadd.f32 %v1652_v0, %v1255_v7  ;;  %v1464_v7 = vld [vmem:[%s2277_s9 + $0x70] sm:$0xff] }
 0x528   :  { %1471 = vmatpush.msra.mxu1 %v1464_v7 }
 0x529   :  { %v1259_v8 = vadd.f32 %v1256_v48, %v1897_v5  ;;  %v1463_v48 = vld [vmem:[%s2277_s9 + $0x68] sm:$0xff] }
 0x52a   :  { %1472 = vmatpush.msra.mxu1 %v1463_v48 }
 0x52b   :  { %v1265_v41 = vsel %vm59_vm0, %v1259_v8, 0.0 }
 0x52c   :  { %1266 = vadd.xlane.f32.xlu1 %v1265_v41  ;;  %v1462_v41 = vld [vmem:[%s2277_s9 + $0x60] sm:$0xff] }
 0x52d   :  { %1473 = vmatpush.msra.mxu1 %v1462_v41 }
 0x52f   :  { %1474 = vmatpush.msra.mxu1 %v1461_v10 }
 0x531   :  { %1475 = vmatpush.msra.mxu1 %v1460_v12 }
 0x533   :  { %1476 = vmatpush.msra.mxu1 %v1459_v15 }
 0x597   :  { %v1264_v4 = vpop.xlane.xlu1 %1263 }
 0x598   :  { %v1275_v20 = vmul.f32 %v2117_v18, %v1264_v4 }
 0x59a   :  { %v1277_v29 = vsub.f32 %v1258_v3, %v1275_v20  ;;  %v1458_v20 = vld [vmem:[%s2277_s9 + $0x40] sm:$0xff] }
 0x59b   :  { %1477 = vmatpush.msra.mxu1 %v1458_v20 }
 0x59c   :  { %v1279_v51 = vmul.f32 %v1277_v29, %v1277_v29 }
 0x59e   :  { %v1281_v5 = vsel %vm59_vm0, %v1279_v51, 0.0 }
 0x59f   :  { %1282 = vadd.xlane.f32.xlu1 %v1281_v5  ;;  %v1267_v21 = vpop.xlane.xlu1 %1266  ;;  %v1457_v5 = vld [vmem:[%s2277_s9 + $0x38] sm:$0xff] }
 0x5a0   :  { %v1276_v23 = vmul.f32 %v2117_v18, %v1267_v21  ;;  %1478 = vmatpush.msra.mxu1 %v1457_v5 }
 0x5a2   :  { %v1278_v24 = vsub.f32 %v1259_v8, %v1276_v23  ;;  %v1655_v8 = vld [vmem:[%s2276_s8] ss:$0 sm:$0xff] }
 0x5a4   :  { %v1280_v13 = vmul.f32 %v1278_v24, %v1278_v24 }
 0x5a6   :  { %v1284_v25 = vsel %vm59_vm0, %v1280_v13, 0.0  ;;  %v1456_v13 = vld [vmem:[%s2277_s9 + $0x30] sm:$0xff] }
 0x5a7   :  { %1285 = vadd.xlane.f32.xlu1 %v1284_v25  ;;  %1479 = vmatpush.msra.mxu1 %v1456_v13 }
 0x5a9   :  { %1480 = vmatpush.msra.mxu1 %v1455_v26 }
 0x5c0   :  { %916 = vrot.lane.b32.xlu1 %v2089_v38, %s1786_s3 }
 0x5c8   :  { %920 = vrot.lane.b32.xlu1 %v2080_v49, %s1787_s4 }
 0x5d0   :  { %924 = vrot.lane.b32.xlu1 %v2073_v43, %s1788_s26 }
 0x612   :  { %v1283_v27 = vpop.xlane.xlu1 %1282 }
 0x613   :  { %v1287_v28 = vmul.f32 %v1283_v27, %v2117_v18 }
 0x615   :  { %v1289_v40 = vadd.f32 1e-12, %v1287_v28 }
 0x617   :  { %1693 = vrsqrt.f32 %v1289_v40  ;;  %vm1297_vm9 = vweird.f32 %v1289_v40 }
 0x61a   :  { %v1286_v30 = vpop.xlane.xlu1 %1285 }
 0x61b   :  { %v1288_v43 = vmul.f32 %v1286_v30, %v2117_v18 }
 0x61d   :  { %v1694_v22 = vpop.eup %1693  ;;  %v1290_v32 = vadd.f32 1e-12, %v1288_v43 }
 0x61e   :  { %v1292_v35 = vmul.f32 %v1694_v22, %v1289_v40  ;;  %vm1298_vm8 = vweird.f32 %v1694_v22  ;;  %v1454_v40 = vld [vmem:[%s2277_s9 + $0x20] sm:$0xff] }
 0x61f   :  { %1695 = vrsqrt.f32 %v1290_v32  ;;  %vm1299_vm11 = vmor %vm1297_vm9, %vm1298_vm8  ;;  %vm1307_vm13 = vweird.f32 %v1290_v32  ;;  %1481 = vmatpush.msra.mxu1 %v1454_v40 }
 0x620   :  { %v1293_v16 = vmul.f32 %v1694_v22, %v1292_v35 }
 0x622   :  { %v1294_v42 = vmul.f32 0.5, %v1293_v16 }
 0x624   :  { %v1295_v44 = vsub.f32 1.5, %v1294_v42  ;;  %v1452_v42 = vld [vmem:[%s2277_s9 + $0x10] sm:$0xff] }
 0x625   :  { %v1696_v45 = vpop.eup %1695 }
 0x626   :  { %v1296_v49 = vmul.f32 %v1694_v22, %v1295_v44  ;;  %v1302_v50 = vmul.f32 %v1696_v45, %v1290_v32  ;;  %vm1308_vm12 = vweird.f32 %v1696_v45  ;;  %v1453_v32 = vld [vmem:[%s2277_s9 + $0x18] sm:$0xff] }
 0x627   :  { %vm1309_vm14 = vmor %vm1307_vm13, %vm1308_vm12  ;;  %1482 = vmatpush.msra.mxu1 %v1453_v32 }
 0x628   :  { %v1300_v38 = vsel %vm1299_vm11, %v1694_v22, %v1296_v49  ;;  %v1303_v34 = vmul.f32 %v1696_v45, %v1302_v50 }
 0x629   :  { %v1311_v52 = vmul.f32 %v1300_v38, %v1277_v29  ;;  %1483 = vmatpush.msra.mxu1 %v1452_v42  ;;  %v1450_v38 = vld [vmem:[%s2277_s9] sm:$0xff] }
 0x62a   :  { %v1304_v19 = vmul.f32 0.5, %v1303_v34 }
 0x62b   :  { %v1316_v56 = vmul.f32 %v1653_v36, %v1311_v52 }
 0x62c   :  { %v1305_v57 = vsub.f32 1.5, %v1304_v19 }
 0x62d   :  { %v2146_v58 = vadd.f32 %v1654_v39, %v1316_v56 }
 0x62e   :  { %v1306_v46 = vmul.f32 %v1696_v45, %v1305_v57 }
 0x62f   :  { %1632 = vmatmul.msk.f32.vlgmr.msrb.gmra.mxu0 %vm59_vm0, %v2146_v58  ;;  %1323 = vst.msk [vmem:[#allocation6] sm:$0xff] %vm59_vm0, %v2146_v58 }
 0x630   :  { %v1310_v60 = vsel %vm1309_vm14, %v1696_v45, %v1306_v46  ;;  %vm941_vm14 = vcmask 326656  }
 0x631   :  { %v1312_v62 = vmul.f32 %v1310_v60, %v1278_v24 }
 0x632   :  { %v917_v63 = vpop.permute.xlu1 %916 }
 0x633   :  { %v939_v0 = vsel %vm938_vm2, %v937_v37, %v917_v63  ;;  %v1317_v1 = vmul.f32 %v1653_v36, %v1312_v62  ;;  %v1451_v36 = vld [vmem:[%s2277_s9 + $0x8] sm:$0xff]  ;;  %vm943_vm2 = vcmask 392192  }
 0x634   :  { %1484 = vmatpush.msra.mxu1 %v1451_v36 }
 0x635   :  { %v2154_v2 = vadd.f32 %v1654_v39, %v1317_v1 }
 0x636   :  { %1485 = vmatpush.msra.mxu1 %v1450_v38 }
 0x637   :  { %1324 = vst.msk [vmem:[#allocation6 + $0x8] sm:$0xff] %vm59_vm0, %v2154_v2  ;;  %1633 = vmatmul.msk.f32.gmra.mxu0 %vm59_vm0, %v2154_v2 }
 0x63a   :  { %v921_v54 = vpop.permute.xlu1 %920 }
 0x63b   :  { %v2161_v3 = vsel %vm59_vm0, %v939_v0, %v921_v54 }
 0x6ac   :  { %v1356_v9 = vpop.f32.mrf.mxu0 }
 0x6ad   :  { %v2181_v11 = vadd.f32 %v1655_v8, %v1356_v9 }
 0x6af   :  { %v2187_v14 = vmul.f32 0.70710677, %v2181_v11 }
 0x6b1   :  { %v1366_v4 = vmul.f32 %v2187_v14, %v2187_v14 }
 0x6b3   :  { %v1367_v29 = vmin.f32 %v1366_v4, 16.0 }
 0x6b4   :  { %v1359_v51 = vpop.f32.mrf.mxu0 }
 0x6b5   :  { %v1368_v21 = vmul.f32 2.1237322e-06, %v1367_v29  ;;  %v1379_v23 = vmul.f32 3.8918573e-05, %v1367_v29  ;;  %v2200_v24 = vadd.f32 %v1655_v8, %v1359_v51 }
 0x6b7   :  { %v1369_v25 = vadd.f32 0.00028619796, %v1368_v21  ;;  %v1380_v33 = vadd.f32 0.001143296, %v1379_v23  ;;  %v2206_v31 = vmul.f32 0.70710677, %v2200_v24 }
 0x6b9   :  { %v1370_v17 = vmul.f32 %v1369_v25, %v1367_v29  ;;  %v1381_v27 = vmul.f32 %v1380_v33, %v1367_v29  ;;  %v1406_v28 = vmul.f32 %v2206_v31, %v2206_v31 }
 0x6bb   :  { %v1382_v30 = vadd.f32 0.014752088, %v1381_v27  ;;  %v1371_v43 = vadd.f32 0.0036580483, %v1370_v17  ;;  %v1407_v22 = vmin.f32 %v1406_v28, 16.0 }
 0x6bd   :  { %v1383_v35 = vmul.f32 %v1382_v30, %v1367_v29  ;;  %v1408_v16 = vmul.f32 2.1237322e-06, %v1407_v22  ;;  %v1419_v44 = vmul.f32 3.8918573e-05, %v1407_v22  ;;  %v1372_v49 = vmul.f32 %v1371_v43, %v1367_v29 }
 0x6bf   :  { %v1384_v45 = vadd.f32 0.112945676, %v1383_v35  ;;  %v1409_v50 = vadd.f32 0.00028619796, %v1408_v16  ;;  %v1420_v34 = vadd.f32 0.001143296, %v1419_v44 }
 0x6c0   :  { %v1373_v47 = vadd.f32 0.05243302, %v1372_v49  ;;  %v1362_v16 = vmul.f32 0.5, %v2181_v11  ;;  %v1656_v11 = vld [vmem:[%s2278_s10] ss:$0 sm:$0xff]  ;;  %s1790_s10 = smov 56  }
 0x6c1   :  { %v1385_v52 = vmul.f32 %v1384_v45, %v1367_v29  ;;  %v1410_v39 = vmul.f32 %v1409_v50, %v1407_v22  ;;  %v1421_v19 = vmul.f32 %v1420_v34, %v1407_v22  ;;  %v1363_v34 = vmul.f32 0.5, %v2200_v24 }
 0x6c2   :  { %v1374_v62 = vmul.f32 %v1373_v47, %v1367_v29 }
 0x6c3   :  { %v1386_v56 = vadd.f32 0.4994258, %v1385_v52  ;;  %v1422_v57 = vadd.f32 0.014752088, %v1421_v19  ;;  %v1411_v59 = vadd.f32 0.0036580483, %v1410_v39 }
 0x6c4   :  { %v1375_v1 = vadd.f32 0.18741608, %v1374_v62 }
 0x6c5   :  { %v1387_v46 = vmul.f32 %v1386_v56, %v1367_v29  ;;  %v1423_v60 = vmul.f32 %v1422_v57, %v1407_v22  ;;  %v1412_v37 = vmul.f32 %v1411_v59, %v1407_v22 }
 0x6c6   :  { %v1376_v8 = vmul.f32 %v1375_v1, %v1367_v29 }
 0x6c7   :  { %v1388_v61 = vadd.f32 1.0, %v1387_v46  ;;  %v1424_v63 = vadd.f32 0.112945676, %v1423_v60  ;;  %v1413_v6 = vadd.f32 0.05243302, %v1412_v37  ;;  %v925_v60 = vpop.permute.xlu1 %924 }
 0x6c8   :  { %v1377_v4 = vadd.f32 1.1283791, %v1376_v8 }
 0x6c9   :  { %1697 = vrcp.f32 %v1388_v61  ;;  %v1425_v0 = vmul.f32 %v1424_v63, %v1407_v22  ;;  %v1414_v10 = vmul.f32 %v1413_v6, %v1407_v22  ;;  %v1400_v15 = vand.u32 2147483648, %v1388_v61 }
 0x6ca   :  { %v1398_v51 = vand.u32 2147483647, %v1388_v61  ;;  %vm1394_vm3 = vweird.f32 %v1388_v61  ;;  %v1378_v25 = vmul.f32 %v1377_v4, %v2187_v14 }
 0x6cb   :  { %v1426_v54 = vadd.f32 0.4994258, %v1425_v0  ;;  %v1415_v5 = vadd.f32 0.18741608, %v1414_v10  ;;  %v1401_v23 = vor.u32 1.1754944e-38, %v1400_v15 }
 0x6cc   :  { %vm1399_vm5 = vcmp.eq.f32.partialorder %v1398_v51, 8.507059e+37 }
 0x6cd   :  { %v1427_v7 = vmul.f32 %v1426_v54, %v1407_v22  ;;  %v1416_v26 = vmul.f32 %v1415_v5, %v1407_v22 }
 0x6cf   :  { %v1698_v48 = vpop.eup %1697  ;;  %v1428_v9 = vadd.f32 1.0, %v1427_v7  ;;  %v1417_v43 = vadd.f32 1.1283791, %v1416_v26 }
 0x6d0   :  { %v1390_v41 = vmul.f32 %v1698_v48, %v1388_v61  ;;  %vm1395_vm1 = vweird.f32 %v1698_v48 }
 0x6d1   :  { %1699 = vrcp.f32 %v1428_v9  ;;  %vm1396_vm4 = vmor %vm1394_vm3, %vm1395_vm1  ;;  %v1440_v30 = vand.u32 2147483648, %v1428_v9  ;;  %v1438_v35 = vand.u32 2147483647, %v1428_v9  ;;  %vm1434_vm7 = vweird.f32 %v1428_v9 }
 0x6d2   :  { %v1391_v12 = vsub.f32 1.0, %v1390_v41  ;;  %v1418_v49 = vmul.f32 %v1417_v43, %v2206_v31  ;;  %vm945_vm3 = vcmask 457728  }
 0x6d3   :  { %v1441_v14 = vor.u32 1.1754944e-38, %v1440_v30  ;;  %vm1439_vm8 = vcmp.eq.f32.partialorder %v1438_v35, 8.507059e+37  ;;  %v942_v30 = vsel %vm941_vm14, %v2161_v3, %v925_v60 }
 0x6d4   :  { %v1392_v20 = vmul.f32 %v1698_v48, %v1391_v12 }
 0x6d6   :  { %v1393_v21 = vadd.f32 %v1698_v48, %v1392_v20 }
 0x6d7   :  { %v1700_v13 = vpop.eup %1699 }
 0x6d8   :  { %v1397_v33 = vsel %vm1396_vm4, %v1698_v48, %v1393_v21  ;;  %v1430_v17 = vmul.f32 %v1700_v13, %v1428_v9  ;;  %vm1435_vm6 = vweird.f32 %v1700_v13  ;;  %vm947_vm4 = vcmask 523264  }
 0x6d9   :  { %v1402_v29 = vsel %vm1399_vm5, %v1401_v23, %v1397_v33  ;;  %vm1436_vm10 = vmor %vm1434_vm7, %vm1435_vm6  ;;  %v1658_v33 = vld [vmem:[%s2280_s12] ss:$0 sm:$0xff]  ;;  %s1792_s12 = smov [#allocation6]  }
 0x6da   :  { %v1403_v27 = vmul.f32 %v1402_v29, %v1378_v25  ;;  %v1431_v28 = vsub.f32 1.0, %v1430_v17  ;;  %s1581_s18 = sshll.u32 %s1792_s12, 4  ;;  %s1582_s18 = int_to_ptr.vmem [resolvable:$true] %s1581_s18 }
 0x6dc   :  { %v1634_v40 = vclamps-f32 %v1403_v27, 1.0  ;;  %v1432_v32 = vmul.f32 %v1700_v13, %v1431_v28 }
 0x6de   :  { %v1446_v42 = vadd.f32 1.0, %v1634_v40  ;;  %v1433_v44 = vadd.f32 %v1700_v13, %v1432_v32 }
 0x6e0   :  { %v1448_v45 = vmul.f32 %v1446_v42, %v1362_v16  ;;  %v1437_v22 = vsel %vm1436_vm10, %v1700_v13, %v1433_v44 }
 0x6e1   :  { %v1442_v50 = vsel %vm1439_vm8, %v1441_v14, %v1437_v22 }
 0x6e2   :  { %1486 = vmatmul.f32.vlgmr.msra.gmra.mxu1 %v1448_v45  ;;  %v1443_v36 = vmul.f32 %v1442_v50, %v1418_v49 }
 0x6e4   :  { %v1635_v38 = vclamps-f32 %v1443_v36, 1.0 }
 0x6e6   :  { %v1447_v52 = vadd.f32 1.0, %v1635_v38 }
 0x6e8   :  { %v1449_v39 = vmul.f32 %v1447_v52, %v1363_v34 }
 0x6ea   :  { %1489 = vmatmul.f32.gmra.mxu1 %v1449_v39 }
 0x75f   :  { %v1487_v19 = vpop.f32.mrf.mxu1 }
 0x760   :  { %v1488_v56 = vadd.f32 %v1656_v11, %v1487_v19 }
 0x762   :  { %v1493_v47 = vadd.f32 %v1488_v56, %v2146_v58 }
 0x764   :  { %v1497_v31 = vsel %vm59_vm0, %v1493_v47, 0.0 }
 0x765   :  { %1498 = vadd.xlane.f32.xlu1 %v1497_v31 }
 0x767   :  { %v1490_v57 = vpop.f32.mrf.mxu1 }
 0x768   :  { %v1491_v46 = vadd.f32 %v1656_v11, %v1490_v57 }
 0x76a   :  { %v1494_v59 = vadd.f32 %v1491_v46, %v2154_v2 }
 0x76c   :  { %v1500_v24 = vsel %vm59_vm0, %v1494_v59, 0.0 }
 0x76d   :  { %1501 = vadd.xlane.f32.xlu1 %v1500_v24 }
 0x786   :  { %928 = vrot.lane.b32.xlu1 %v2092_v55, %s1789_s29 }
 0x7d8   :  { %v1499_v61 = vpop.xlane.xlu1 %1498 }
 0x7d9   :  { %v1503_v62 = vmul.f32 %v1499_v61, %v2117_v18 }
 0x7db   :  { %v1505_v63 = vsub.f32 %v1493_v47, %v1503_v62 }
 0x7dd   :  { %v1507_v37 = vmul.f32 %v1505_v63, %v1505_v63 }
 0x7df   :  { %v1509_v58 = vsel %vm59_vm0, %v1507_v37, 0.0 }
 0x7e0   :  { %1510 = vadd.xlane.f32.xlu1 %v1509_v58  ;;  %v1502_v0 = vpop.xlane.xlu1 %1501 }
 0x7e1   :  { %v1504_v1 = vmul.f32 %v1502_v0, %v2117_v18 }
 0x7e3   :  { %v1506_v54 = vsub.f32 %v1494_v59, %v1504_v1 }
 0x7e5   :  { %v1508_v2 = vmul.f32 %v1506_v54, %v1506_v54 }
 0x7e7   :  { %v1512_v6 = vsel %vm59_vm0, %v1508_v2, 0.0 }
 0x7e8   :  { %1513 = vadd.xlane.f32.xlu1 %v1512_v6 }
 0x7f8   :  { %v929_v55 = vpop.permute.xlu1 %928 }
 0x7f9   :  { %v944_v32 = vsel %vm943_vm2, %v942_v30, %v929_v55 }
 0x801   :  { %932 = vrot.lane.b32.xlu1 %v2083_v53, %s1790_s10  ;;  %v1657_v53 = vld [vmem:[%s2279_s11] ss:$0 sm:$0xff]  ;;  %s1791_s11 = smov [#allocation4]  }
 0x802   :  { %s1571_s17 = sshll.u32 %s1791_s11, 4  ;;  %s1572_s17 = int_to_ptr.vmem [resolvable:$true] %s1571_s17 }
 0x853   :  { %v1511_v7 = vpop.xlane.xlu1 %1510 }
 0x854   :  { %v1515_v48 = vmul.f32 %v1511_v7, %v2117_v18 }
 0x856   :  { %v1517_v8 = vadd.f32 1e-12, %v1515_v48 }
 0x858   :  { %1701 = vrsqrt.f32 %v1517_v8  ;;  %vm1525_vm11 = vweird.f32 %v1517_v8 }
 0x85b   :  { %v1514_v41 = vpop.xlane.xlu1 %1513 }
 0x85c   :  { %v1516_v9 = vmul.f32 %v1514_v41, %v2117_v18 }
 0x85e   :  { %v1702_v10 = vpop.eup %1701  ;;  %v1518_v15 = vadd.f32 1e-12, %v1516_v9 }
 0x85f   :  { %v1520_v12 = vmul.f32 %v1702_v10, %v1517_v8  ;;  %vm1526_vm9 = vweird.f32 %v1702_v10 }
 0x860   :  { %1703 = vrsqrt.f32 %v1518_v15  ;;  %vm1527_vm12 = vmor %vm1525_vm11, %vm1526_vm9  ;;  %vm1535_vm15 = vweird.f32 %v1518_v15 }
 0x861   :  { %v1521_v4 = vmul.f32 %v1702_v10, %v1520_v12 }
 0x863   :  { %v1522_v20 = vmul.f32 0.5, %v1521_v4 }
 0x865   :  { %v1523_v51 = vsub.f32 1.5, %v1522_v20 }
 0x866   :  { %v1704_v5 = vpop.eup %1703 }
 0x867   :  { %v1524_v21 = vmul.f32 %v1702_v10, %v1523_v51  ;;  %v1530_v23 = vmul.f32 %v1704_v5, %v1518_v15  ;;  %vm1536_vm13 = vweird.f32 %v1704_v5 }
 0x868   :  { %vm1537_vm1 = vmor %vm1535_vm15, %vm1536_vm13 }
 0x869   :  { %v1528_v13 = vsel %vm1527_vm12, %v1702_v10, %v1524_v21  ;;  %v1531_v18 = vmul.f32 %v1704_v5, %v1530_v23 }
 0x86a   :  { %v1539_v25 = vmul.f32 %v1528_v13, %v1505_v63 }
 0x86b   :  { %v1532_v26 = vmul.f32 0.5, %v1531_v18 }
 0x86c   :  { %v1544_v29 = vmul.f32 %v1657_v53, %v1539_v25 }
 0x86d   :  { %v1533_v17 = vsub.f32 1.5, %v1532_v26 }
 0x86e   :  { %v1549_v27 = vadd.f32 %v1658_v33, %v1544_v29 }
 0x86f   :  { %v1534_v28 = vmul.f32 %v1704_v5, %v1533_v17 }
 0x870   :  { %1551 = vst.msk [vmem:[#allocation2] sm:$0xff] %vm59_vm0, %v1549_v27 }
 0x871   :  { %v1538_v40 = vsel %vm1537_vm1, %v1704_v5, %v1534_v28 }
 0x872   :  { %v1540_v43 = vmul.f32 %v1538_v40, %v1506_v54 }
 0x873   :  { %v933_v35 = vpop.permute.xlu1 %932 }
 0x874   :  { %v1545_v16 = vmul.f32 %v1657_v53, %v1540_v43  ;;  %v946_v42 = vsel %vm945_vm3, %v944_v32, %v933_v35 }
 0x875   :  { %948 = vst.msk [vmem:[#allocation4] sm:$0xff] %vm947_vm4, %v946_v42 }
 0x876   :  { %1576 = dma.vmem_to_hbm [thread:$0]  %s1572_s17, 128, %s1574_s7, [#allocation5]   ;;  %v1550_v3 = vadd.f32 %v1658_v33, %v1545_v16 }
 0x877   :  { %1589 = dma.vmem_to_hbm [thread:$0]  %s1582_s18, 256, %s1584_s6, [#allocation5], %s1794_s15, %s1794_s15, %s1783_s22  }
 0x878   :  { %1552 = vst.msk [vmem:[#allocation2 + $0x8] sm:$0xff] %vm59_vm0, %v1550_v3 }
 0x879   :  { %1565 = dma.vmem_to_hbm [thread:$0]  %s1558_s20, 256, %s1560_s24, [#allocation3], %s1794_s15, %s1794_s15, %s1783_s22  }
 0x87a   :  { %1777 = dma.done.wait [#allocation3], 256  }
 0x87b   :  { %1778 = vsyncadd [#allocation3], 4294967040 }
 0x87c   :  { %1779 = dma.done.wait [#allocation5], 384  }
 0x87d   :  { %1780 = vsyncadd [#allocation5], 4294966912 }
 0x87e   :  { %1602 = vsyncpa [#allocation3], 1 }
 0x87f   :  { %1603 = vsyncpa [#allocation5], 1 }

</bundles_post_ra>
